<compile_context>
chip_gen: v7x
topology: tpu7x:2x2x1
jax: 0.10.0
libtpu: 0.0.40
codegen_flags: <defaults>
</compile_context>

<pallas_src>
import functools

import jax
import jax.numpy as jnp
from jax.experimental import pallas as pl
from jax.experimental.pallas import tpu as pltpu

_LANE = 128


def _round_up(x, m):
    return (x + m - 1) // m * m


def _choose_hw_tile(hwp):
    """Largest 128-multiple tile <= 2048 lanes that divides the padded HW."""
    for t in (2048, 1024, 512, 384, 256, 128):
        if hwp % t == 0:
            return t
    return _LANE


def _choose_nb(n, c, t, target_bytes=1 << 20):
    """Images per grid step: ~<=1 MiB per input block, Nb must divide N."""
    nb = max(1, min(n, target_bytes // max(1, c * t * 4)))
    while n % nb:
        nb -= 1
    return nb


def _pool_scale_kernel(x_ref, w1t_ref, b1_ref, w2t_ref, b2_ref,
                       scale_ref, acc_ref, *, inv_hw):
    # x_ref: (Nb, C, T)   w1t: (C, Cr)  b1: (1, Cr)  w2t: (Cr, C)  b2: (1, C)
    # scale_ref: (1, Nb, C)   acc_ref: VMEM (Nb, C) f32
    j = pl.program_id(1)

    @pl.when(j == 0)
    def _():
        acc_ref[...] = jnp.zeros_like(acc_ref)

    # Partial spatial sum for this HW tile (zero padding does not perturb it).
    acc_ref[...] += jnp.sum(x_ref[...].astype(jnp.float32), axis=2)

    @pl.when(j == pl.num_programs(1) - 1)
    def _():
        pooled = acc_ref[...] * inv_hw                              # (Nb, C)
        h = jnp.dot(pooled, w1t_ref[...],
                    preferred_element_type=jnp.float32) + b1_ref[...]
        h = jnp.maximum(h, 0.0)                                     # ReLU
        s = jnp.dot(h, w2t_ref[...],
                    preferred_element_type=jnp.float32) + b2_ref[...]
        scale_ref[0] = jax.nn.sigmoid(s).astype(scale_ref.dtype)    # (Nb, C)


def _apply_scale_kernel(x_ref, scale_ref, o_ref):
    # x_ref/o_ref: (Nb, C, T)   scale_ref: (1, Nb, C)
    s = scale_ref[0]                                                # (Nb, C)
    o_ref[...] = x_ref[...] * s[:, :, None].astype(o_ref.dtype)


def ca_layer(x, w1, b1, w2, b2):
    """x: (N, C, H, W) f32. w1: (Cr, C), b1: (Cr,), w2: (C, Cr), b2: (C,)."""
    N, C, H, W = x.shape
    Cr = w1.shape[0]
    HW = H * W
    HWp = _round_up(HW, _LANE)

    x_flat = x.reshape(N, C, HW)
    if HWp != HW:
        x_flat = jnp.pad(x_flat, ((0, 0), (0, 0), (0, HWp - HW)))

    T = _choose_hw_tile(HWp)
    Nb = _choose_nb(N, C, T)
    grid_n = N // Nb
    grid_hw = HWp // T

    # 1x1-conv weights as (in, out) matrices; biases as row vectors.
    w1t = w1.T.astype(jnp.float32)            # (C, Cr)
    w2t = w2.T.astype(jnp.float32)            # (Cr, C)
    b1r = b1.reshape(1, Cr).astype(jnp.float32)
    b2r = b2.reshape(1, C).astype(jnp.float32)

    cparams = dict(vmem_limit_bytes=32 * 1024 * 1024)
    bytes_x = N * C * HWp * 4

    # ---- pass 1: global average pool + tiny MLP -> per-(n, c) scale ---------
    scale = pl.pallas_call(
        functools.partial(_pool_scale_kernel, inv_hw=float(1.0 / HW)),
        out_shape=jax.ShapeDtypeStruct((grid_n, Nb, C), jnp.float32),
        grid_spec=pltpu.PrefetchScalarGridSpec(
            num_scalar_prefetch=0,
            grid=(grid_n, grid_hw),
            in_specs=[
                pl.BlockSpec((Nb, C, T), lambda i, j: (i, 0, j)),
                pl.BlockSpec((C, Cr), lambda i, j: (0, 0)),
                pl.BlockSpec((1, Cr), lambda i, j: (0, 0)),
                pl.BlockSpec((Cr, C), lambda i, j: (0, 0)),
                pl.BlockSpec((1, C), lambda i, j: (0, 0)),
            ],
            out_specs=pl.BlockSpec((1, Nb, C), lambda i, j: (i, 0, 0)),
            scratch_shapes=[pltpu.VMEM((Nb, C), jnp.float32)],
        ),
        compiler_params=pltpu.CompilerParams(
            dimension_semantics=("parallel", "arbitrary"), **cparams),
        cost_estimate=pl.CostEstimate(
            flops=N * C * HWp + 4 * N * C * Cr,
            transcendentals=N * C,
            bytes_accessed=bytes_x + N * C * 4),
    )(x_flat, w1t, b1r, w2t, b2r)

    # ---- pass 2: lane-dense streaming multiply x * scale --------------------
    out = pl.pallas_call(
        _apply_scale_kernel,
        out_shape=jax.ShapeDtypeStruct((N, C, HWp), x.dtype),
        grid_spec=pltpu.PrefetchScalarGridSpec(
            num_scalar_prefetch=0,
            grid=(grid_n, grid_hw),
            in_specs=[
                pl.BlockSpec((Nb, C, T), lambda i, j: (i, 0, j)),
                pl.BlockSpec((1, Nb, C), lambda i, j: (i, 0, 0)),
            ],
            out_specs=pl.BlockSpec((Nb, C, T), lambda i, j: (i, 0, j)),
        ),
        compiler_params=pltpu.CompilerParams(
            dimension_semantics=("parallel", "parallel"), **cparams),
        cost_estimate=pl.CostEstimate(
            flops=N * C * HWp,
            transcendentals=0,
            bytes_accessed=2 * bytes_x + N * C * 4),
    )(x_flat, scale)

    if HWp != HW:
        out = out[:, :, :HW]
    return out.reshape(N, C, H, W)


def ca_layer_ref(x, w1, b1, w2, b2):
    """Pure-JAX reference matching the PyTorch module."""
    y = jnp.mean(x, axis=(2, 3), keepdims=True)                       # (N,C,1,1)
    y = jnp.einsum('oc,nchw->nohw', w1, y) + b1[None, :, None, None]  # 1x1 conv
    y = jnp.maximum(y, 0.0)
    y = jnp.einsum('oc,nchw->nohw', w2, y) + b2[None, :, None, None]  # 1x1 conv
    y = jax.nn.sigmoid(y)
    return x * y


if __name__ == "__main__":
    key = jax.random.PRNGKey(0)
    N, C, H, W = 2, 32, 16, 16
    reduction_rate = 16
    Cr = C // reduction_rate   # = 2

    k_x, k_w1, k_b1, k_w2, k_b2 = jax.random.split(key, 5)
    x = jax.random.normal(k_x, (N, C, H, W), dtype=jnp.float32)
    # Deterministic synthetic parameters (1x1 conv kernels squeezed to matrices).
    w1 = jax.random.normal(k_w1, (Cr, C), dtype=jnp.float32) * 0.1
    b1 = jax.random.normal(k_b1, (Cr,), dtype=jnp.float32) * 0.1
    w2 = jax.random.normal(k_w2, (C, Cr), dtype=jnp.float32) * 0.1
    b2 = jax.random.normal(k_b2, (C,), dtype=jnp.float32) * 0.1

    out = jax.block_until_ready(ca_layer(x, w1, b1, w2, b2))
    ref = jax.block_until_ready(ca_layer_ref(x, w1, b1, w2, b2))
    assert out.shape == (N, C, H, W)
    assert jnp.allclose(out, ref, atol=1e-5, rtol=1e-5)
    print("KERNEL_OK")
</pallas_src>

<mosaic_0001>
module attributes {stable_mosaic.version = 11 : i64} {
  func.func @_pool_scale_kernel(%arg0: i32, %arg1: i32, %arg2: memref<2x32x256xf32, #tpu.memory_space<vmem>>, %arg3: memref<32x2xf32, #tpu.memory_space<vmem>>, %arg4: memref<1x2xf32, #tpu.memory_space<vmem>>, %arg5: memref<2x32xf32, #tpu.memory_space<vmem>>, %arg6: memref<1x32xf32, #tpu.memory_space<vmem>>, %arg7: memref<1x2x32xf32, #tpu.memory_space<vmem>>, %arg8: memref<2x32xf32, #tpu.memory_space<vmem>>) attributes {dimension_semantics = [#tpu.dimension_semantics<parallel>, #tpu.dimension_semantics<arbitrary>], iteration_bounds = array<i64: 1, 1>, scalar_prefetch = 0 : i64, scratch_operands = 1 : i64, tpu.core_type = #tpu.core_type<tc>, window_params = [{transform_indices = @transform_0, window_bounds = array<i64: 2, 32, 256>}, {pipeline_mode = #tpu.pipeline_mode<synchronous>, transform_indices = @transform_1, window_bounds = array<i64: 32, 2>}, {pipeline_mode = #tpu.pipeline_mode<synchronous>, transform_indices = @transform_2, window_bounds = array<i64: 1, 2>}, {pipeline_mode = #tpu.pipeline_mode<synchronous>, transform_indices = @transform_3, window_bounds = array<i64: 2, 32>}, {pipeline_mode = #tpu.pipeline_mode<synchronous>, transform_indices = @transform_4, window_bounds = array<i64: 1, 32>}, {transform_indices = @transform_5, window_bounds = array<i64: 1, 2, 32>}]} {
    %c0_i32 = arith.constant 0 : i32
    %0 = arith.cmpi eq, %arg1, %c0_i32 : i32
    %1 = arith.extui %0 : i1 to i32
    %c0_i32_0 = arith.constant 0 : i32
    %2 = arith.cmpi ne, %1, %c0_i32_0 : i32
    scf.if %2 {
      %cst_9 = arith.constant 0.000000e+00 : f32
      %11 = vector.broadcast %cst_9 : f32 to vector<2x32xf32>
      %c0_10 = arith.constant 0 : index
      %c0_11 = arith.constant 0 : index
      %12 = vector.load %arg8[%c0_10, %c0_11] : memref<2x32xf32, #tpu.memory_space<vmem>>, vector<2x32xf32>
      tpu.vector_store %arg8[%c0_10, %c0_11], %11 {strides = array<i32>} : memref<2x32xf32, #tpu.memory_space<vmem>>, vector<2x32xf32>,
    } else {
    }
    %c0 = arith.constant 0 : index
    %c0_1 = arith.constant 0 : index
    %3 = vector.load %arg8[%c0, %c0_1] : memref<2x32xf32, #tpu.memory_space<vmem>>, vector<2x32xf32>
    %c0_2 = arith.constant 0 : index
    %c0_3 = arith.constant 0 : index
    %c0_4 = arith.constant 0 : index
    %4 = vector.load %arg2[%c0_2, %c0_3, %c0_4] : memref<2x32x256xf32, #tpu.memory_space<vmem>>, vector<2x32x256xf32>
    %cst = arith.constant dense<0.000000e+00> : vector<2x32xf32>
    %5 = vector.multi_reduction <add>, %4, %cst [2] : vector<2x32x256xf32> to vector<2x32xf32>
    %6 = arith.addf %3, %5 : vector<2x32xf32>
    %c0_5 = arith.constant 0 : index
    %c0_6 = arith.constant 0 : index
    %7 = vector.load %arg8[%c0_5, %c0_6] : memref<2x32xf32, #tpu.memory_space<vmem>>, vector<2x32xf32>
    tpu.vector_store %arg8[%c0_5, %c0_6], %6 {strides = array<i32>} : memref<2x32xf32, #tpu.memory_space<vmem>>, vector<2x32xf32>,
    %c0_i32_7 = arith.constant 0 : i32
    %8 = arith.cmpi eq, %arg1, %c0_i32_7 : i32
    %9 = arith.extui %8 : i1 to i32
    %c0_i32_8 = arith.constant 0 : i32
    %10 = arith.cmpi ne, %9, %c0_i32_8 : i32
    scf.if %10 {
      %c0_9 = arith.constant 0 : index
      %c0_10 = arith.constant 0 : index
      %11 = vector.load %arg8[%c0_9, %c0_10] : memref<2x32xf32, #tpu.memory_space<vmem>>, vector<2x32xf32>
      %cst_11 = arith.constant 3.906250e-03 : f32
      %12 = vector.broadcast %cst_11 : f32 to vector<2x32xf32>
      %13 = arith.mulf %11, %12 : vector<2x32xf32>
      %c0_12 = arith.constant 0 : index
      %c0_13 = arith.constant 0 : index
      %14 = vector.load %arg3[%c0_12, %c0_13] : memref<32x2xf32, #tpu.memory_space<vmem>>, vector<32x2xf32>
      %cst_14 = arith.constant dense<0.000000e+00> : vector<2x2xf32>
      %15 = tpu.matmul %13, %14, %cst_14 {dimension_numbers = #tpu.dot_dimension_numbers<[1], [0], [0], [1], [0, 0, 1, 1], [], []>} : vector<2x32xf32>, vector<32x2xf32>, vector<2x2xf32> -> vector<2x2xf32>
      %c0_15 = arith.constant 0 : index
      %c0_16 = arith.constant 0 : index
      %16 = vector.load %arg4[%c0_15, %c0_16] : memref<1x2xf32, #tpu.memory_space<vmem>>, vector<1x2xf32>
      %17 = vector.broadcast %16 : vector<1x2xf32> to vector<2x2xf32>
      %18 = arith.addf %15, %17 : vector<2x2xf32>
      %cst_17 = arith.constant 0.000000e+00 : f32
      %19 = vector.broadcast %cst_17 : f32 to vector<2x2xf32>
      %20 = arith.maximumf %18, %19 : vector<2x2xf32>
      %c0_18 = arith.constant 0 : index
      %c0_19 = arith.constant 0 : index
      %21 = vector.load %arg5[%c0_18, %c0_19] : memref<2x32xf32, #tpu.memory_space<vmem>>, vector<2x32xf32>
      %cst_20 = arith.constant dense<0.000000e+00> : vector<2x32xf32>
      %22 = tpu.matmul %20, %21, %cst_20 {dimension_numbers = #tpu.dot_dimension_numbers<[1], [0], [0], [1], [0, 0, 1, 1], [], []>} : vector<2x2xf32>, vector<2x32xf32>, vector<2x32xf32> -> vector<2x32xf32>
      %c0_21 = arith.constant 0 : index
      %c0_22 = arith.constant 0 : index
      %23 = vector.load %arg6[%c0_21, %c0_22] : memref<1x32xf32, #tpu.memory_space<vmem>>, vector<1x32xf32>
      %24 = vector.broadcast %23 : vector<1x32xf32> to vector<2x32xf32>
      %25 = arith.addf %22, %24 : vector<2x32xf32>
      %26 = arith.negf %25 : vector<2x32xf32>
      %27 = math.exp %26 : vector<2x32xf32>
      %cst_23 = arith.constant 1.000000e+00 : f32
      %28 = vector.broadcast %cst_23 : f32 to vector<2x32xf32>
      %29 = arith.addf %28, %27 : vector<2x32xf32>
      %30 = arith.divf %28, %29 : vector<2x32xf32>
      %c0_24 = arith.constant 0 : index
      %c0_25 = arith.constant 0 : index
      %c0_26 = arith.constant 0 : index
      %31 = vector.load %arg7[%c0_24, %c0_25, %c0_26] : memref<1x2x32xf32, #tpu.memory_space<vmem>>, vector<1x2x32xf32>
      %32 = vector.shape_cast %31 : vector<1x2x32xf32> to vector<2x32xf32>
      %33 = vector.shape_cast %30 : vector<2x32xf32> to vector<1x2x32xf32>
      tpu.vector_store %arg7[%c0_24, %c0_25, %c0_26], %33 {strides = array<i32>} : memref<1x2x32xf32, #tpu.memory_space<vmem>>, vector<1x2x32xf32>,
    } else {
    }
    return
  }
  func.func @transform_0(%arg0: i32, %arg1: i32) -> (i32, i32, i32) {
    %c0_i32 = arith.constant 0 : i32
    %c0_i32_0 = arith.constant 0 : i32
    return %arg0, %c0_i32, %arg1 : i32, i32, i32
  }
  func.func @transform_1(%arg0: i32, %arg1: i32) -> (i32, i32) {
    %c0_i32 = arith.constant 0 : i32
    %c0_i32_0 = arith.constant 0 : i32
    %c0_i32_1 = arith.constant 0 : i32
    return %c0_i32, %c0_i32_0 : i32, i32
  }
  func.func @transform_2(%arg0: i32, %arg1: i32) -> (i32, i32) {
    %c0_i32 = arith.constant 0 : i32
    %c0_i32_0 = arith.constant 0 : i32
    %c0_i32_1 = arith.constant 0 : i32
    return %c0_i32, %c0_i32_0 : i32, i32
  }
  func.func @transform_3(%arg0: i32, %arg1: i32) -> (i32, i32) {
    %c0_i32 = arith.constant 0 : i32
    %c0_i32_0 = arith.constant 0 : i32
    %c0_i32_1 = arith.constant 0 : i32
    return %c0_i32, %c0_i32_0 : i32, i32
  }
  func.func @transform_4(%arg0: i32, %arg1: i32) -> (i32, i32) {
    %c0_i32 = arith.constant 0 : i32
    %c0_i32_0 = arith.constant 0 : i32
    %c0_i32_1 = arith.constant 0 : i32
    return %c0_i32, %c0_i32_0 : i32, i32
  }
  func.func @transform_5(%arg0: i32, %arg1: i32) -> (i32, i32, i32) {
    %c0_i32 = arith.constant 0 : i32
    %c0_i32_0 = arith.constant 0 : i32
    %c0_i32_1 = arith.constant 0 : i32
    return %arg0, %c0_i32, %c0_i32_0 : i32, i32, i32
  }
}

</mosaic_0001>

<bundles_post_ra>
// kernel: tpu_custom_call.1
= control target key start
LH: loop header
LB: loop body
LE: loop exit
PB: predicated region body
PF: predicated region fallthrough
CT: control target
= control target key end

     0   :  { %10 = vsyncpa [#allocation4], 0  ;;  %s520_s0 = inlined_call_operand.hbm [shape: f32[2,32,256], index: 0, kind: input, shape index: {}]   ;;  %s521_s1 = inlined_call_operand.vmem [shape: f32[32,2], index: 1, kind: input, shape index: {}]   ;;  %s522_s2 = inlined_call_operand.vmem [shape: f32[1,2], index: 2, kind: input, shape index: {}]   ;;  %s523_s3 = inlined_call_operand.vmem [shape: f32[2,32], index: 3, kind: input, shape index: {}]   ;;  %s524_s4 = inlined_call_operand.vmem [shape: f32[1,32], index: 4, kind: input, shape index: {}]   ;;  %s525_s5 = inlined_call_operand.hbm [shape: f32[1,2,32], index: 5, kind: output, shape index: {}]  }
   0x1   :  { %11 = vsyncpa [#allocation5], 0  ;;  %s435_s18 = smov [#allocation3]   ;;  %s387_s22 = scalar_lea.hbm %s520_s0, 2048 }
   0x2   :  { %s17_s19 = sshll.u32 %s435_s18, 4  ;;  %p388_p0 = scmp.ne.s32.totalorder %s520_s0, %s387_s22  ;;  %s18_s19 = int_to_ptr.vmem [resolvable:$true] %s17_s19 }
   0x3   :  { %p391_p1 = scmp.lt.u32.totalorder %s387_s22, %s520_s0 }
   0x5   :  { %p393_p2 = pnand %p391_p1, %p388_p0 }
   0x7   :  { %396 = shalt.err (!%p393_p2)
}
   0x8   :  { %s397_s27 = scalar_lea.vmem %s18_s19, 2048  ;;  %p402_p4 = scmp.lt.s32.totalorder %s18_s19, %s18_s19 }
   0x9   :  { %p398_p3 = scmp.ne.s32.totalorder %s18_s19, %s397_s27  ;;  %p403_p5 = scmp.lt.s32.totalorder %s397_s27, %s397_s27 }
   0xb   :  { %p404_p6 = por %p403_p5, %p402_p4 }
   0xd   :  { %p405_p7 = pnand %p404_p6, %p398_p3 }
   0xf   :  { %408 = shalt.err (!%p405_p7)
}
  0x10   :  { %s436_s28 = smov 256   ;;  %s437_s29 = smov 16  }
  0x11   :  { %23 = dma.hbm_to_vmem [thread:$0]  %s520_s0, 2048, %s18_s19, [#allocation4], %s436_s28, %s436_s28, %s437_s29  }
  0x12   :  { %431 = dma.done.wait [#allocation4], 2048  }
  0x13   :  { %432 = vsyncadd [#allocation4], 4294965248  ;;  %v50_v0 = vld [vmem:[#allocation3 + $0x40] sm:$0xff]  ;;  %v51_v1 = vld [vmem:[#allocation3 + $0x48] sm:$0xff]  ;;  %vm39_vm0 = vcmask 254976   ;;  %v438_v24 = vmov 0.0   ;;  %v90_v32 = vlaneseq }
  0x14   :  { %v42_v2 = vld [vmem:[#allocation3] sm:$0xff]  ;;  %v70_v3 = vadd.f32 %v51_v1, %v50_v0  ;;  %v43_v4 = vld [vmem:[#allocation3 + $0x8] sm:$0xff]  ;;  %v52_v5 = vld [vmem:[#allocation3 + $0x50] sm:$0xff]  ;;  %40 = vst.msk [vmem:[#allocation2] sm:$0x3] %vm39_vm0, %v438_v24  ;;  %365 = vmatprep.subr.mxu1 %v438_v24  ;;  %v439_v28 = vmov 0.0|0.0  }
  0x15   :  { %v53_v6 = vld [vmem:[#allocation3 + $0x58] sm:$0xff]  ;;  %v58_v7 = vadd.f32 %v43_v4, %v42_v2  ;;  %v44_v8 = vld [vmem:[#allocation3 + $0x10] sm:$0xff]  ;;  %v54_v12 = vld [vmem:[#allocation3 + $0x60] sm:$0xff]  ;;  %370 = vmatprep.subr.bf16.mxu0 %v439_v28  ;;  %vm440_vm1 = vmmov 0   ;;  %v91_v33 = vand.u32 127, %v90_v32  ;;  %v93_v38 = vshrl.u32 %v90_v32, 7 }
  0x16   :  { %v45_v9 = vld [vmem:[#allocation3 + $0x18] sm:$0xff]  ;;  %71 = vadd.xlane.f32.xlu1 %v70_v3  ;;  %v73_v10 = vadd.f32 %v53_v6, %v52_v5  ;;  %v55_v13 = vld [vmem:[#allocation3 + $0x68] sm:$0xff]  ;;  %v46_v14 = vld [vmem:[#allocation3 + $0x20] sm:$0xff]  ;;  %362 = vmatprep.mubr.msk.f32.mxu0 %vm440_vm1, %v438_v24  ;;  %vm101_vm2 = vcmask 130112   ;;  %vm108_vm3 = vcmask 195712   ;;  %vm115_vm4 = vcmask 261312  }
  0x17   :  { %59 = vadd.xlane.f32.xlu0 %v58_v7  ;;  %v61_v11 = vadd.f32 %v45_v9, %v44_v8  ;;  %v47_v15 = vld [vmem:[#allocation3 + $0x28] sm:$0xff]  ;;  %v76_v16 = vadd.f32 %v55_v13, %v54_v12  ;;  %v56_v18 = vld [vmem:[#allocation3 + $0x70] sm:$0xff]  ;;  %v57_v19 = vld [vmem:[#allocation3 + $0x78] sm:$0xff]  ;;  %367 = vmatprep.mubr.msk.f32.mxu1 %vm440_vm1, %v438_v24  ;;  %v96_v36 = vadd.s32 4294967288, %v91_v33  ;;  %v103_v37 = vadd.s32 4294967280, %v91_v33 }
  0x18   :  { %v64_v17 = vadd.f32 %v47_v15, %v46_v14  ;;  %v48_v20 = vld [vmem:[#allocation3 + $0x30] sm:$0xff]  ;;  %v49_v21 = vld [vmem:[#allocation3 + $0x38] sm:$0xff]  ;;  %v79_v22 = vadd.f32 %v57_v19, %v56_v18  ;;  %v148_v26 = vld [vmem:[%s521_s1 + $0x8] sm:$0xff]  ;;  %v110_v42 = vadd.s32 4294967272, %v91_v33  ;;  %v94_v44 = vsub.s32 %v91_v33, %v93_v38 }
  0x19   :  { %v67_v23 = vadd.f32 %v49_v21, %v48_v20  ;;  %v147_v25 = vld [vmem:[%s521_s1] sm:$0xff]  ;;  %v149_v27 = vld [vmem:[%s521_s1 + $0x10] sm:$0xff]  ;;  %v150_v30 = vld [vmem:[%s521_s1 + $0x18] sm:$0xff]  ;;  %v99_v40 = vsub.s32 %v96_v36, %v93_v38  ;;  %v106_v43 = vsub.s32 %v103_v37, %v93_v38  ;;  %vm136_vm5 = vcmask 1041409  }
  0x1a   :  { %74 = vadd.xlane.f32.xlu1 %v73_v10  ;;  %v371_v29 = vpack.c.bf16 %v148_v26, %v147_v25  ;;  %v374_v31 = vpack.c.bf16 %v150_v30, %v149_v27  ;;  %v113_v48 = vsub.s32 %v110_v42, %v93_v38  ;;  %vm158_vm6 = vcmask 261120   ;;  %v233_v5 = vld [vmem:[%s523_s3] sm:$0x3]  ;;  %s441_s3 = smov [#allocation6]  }
  0x1b   :  { %62 = vadd.xlane.f32.xlu0 %v61_v11  ;;  %v41_v63 = vld [vmem:[#allocation2] sm:$0x3]  ;;  %vm245_vm7 = vcmask 1041408   ;;  %vm241_vm8 = vcmask 15360  }
  0x1c   :  { %372 = vmatpush3.bf16.msra.mxu0 %v371_v29  ;;  %366 = vmatpush3.msk.msra.mxu1 %vm245_vm7, %v233_v5  ;;  %v341_v6 = vld [vmem:[%s522_s2] ss:$0 sm:$0xff]  ;;  %s332_s2 = sshll.u32 %s441_s3, 4  ;;  %s333_s2 = int_to_ptr.vmem [resolvable:$true] %s332_s2 }
  0x1d   :  { %373 = vmatprep.subr.bf16.mxu0 %v439_v28  ;;  %v343_v11 = vld [vmem:[%s524_s4] ss:$0 sm:$0xff]  ;;  %s409_s19 = scalar_lea.vmem %s333_s2, 32  ;;  %p414_p9 = scmp.lt.s32.totalorder %s333_s2, %s333_s2 }
  0x1e   :  { %77 = vadd.xlane.f32.xlu1 %v76_v16  ;;  %p410_p8 = scmp.ne.s32.totalorder %s333_s2, %s409_s19  ;;  %p415_p10 = scmp.lt.s32.totalorder %s409_s19, %s409_s19 }
  0x1f   :  { %65 = vadd.xlane.f32.xlu0 %v64_v17 }
  0x20   :  { %375 = vmatpush3.bf16.msra.mxu0 %v374_v31  ;;  %p416_p11 = por %p415_p10, %p414_p9 }
  0x22   :  { %80 = vadd.xlane.f32.xlu1 %v79_v22  ;;  %p417_p12 = pnand %p416_p11, %p410_p8 }
  0x23   :  { %68 = vadd.xlane.f32.xlu0 %v67_v23 }
  0xa3   :  { %v72_v34 = vpop.xlane.xlu1 %71 }
  0xa4   :  { %v60_v35 = vpop.xlane.xlu0 %59  ;;  %v120_v51 = vrot.slane %v72_v34, %v94_v44 }
  0xa5   :  { %v95_v53 = vrot.slane %v60_v35, %v94_v44 }
  0xa7   :  { %v75_v39 = vpop.xlane.xlu1 %74 }
  0xa8   :  { %v63_v41 = vpop.xlane.xlu0 %62  ;;  %v124_v46 = vrot.slane %v75_v39, %v99_v40 }
  0xa9   :  { %v100_v49 = vrot.slane %v63_v41, %v99_v40 }
  0xaa   :  { %v125_v55 = vsel %vm101_vm2, %v124_v46, %v120_v51 }
  0xab   :  { %v78_v45 = vpop.xlane.xlu1 %77  ;;  %v102_v58 = vsel %vm101_vm2, %v100_v49, %v95_v53 }
  0xac   :  { %v66_v47 = vpop.xlane.xlu0 %65  ;;  %v129_v50 = vrot.slane %v78_v45, %v106_v43 }
  0xad   :  { %v107_v52 = vrot.slane %v66_v47, %v106_v43 }
  0xae   :  { %v130_v59 = vsel %vm108_vm3, %v129_v50, %v125_v55 }
  0xaf   :  { %v81_v54 = vpop.xlane.xlu1 %80  ;;  %v109_v61 = vsel %vm108_vm3, %v107_v52, %v102_v58 }
  0xb0   :  { %v134_v56 = vrot.slane %v81_v54, %v113_v48  ;;  %v69_v57 = vpop.xlane.xlu0 %68 }
  0xb1   :  { %v114_v60 = vrot.slane %v69_v57, %v113_v48 }
  0xb2   :  { %v135_v62 = vsel %vm115_vm4, %v134_v56, %v130_v59 }
  0xb3   :  { %v116_v0 = vsel %vm115_vm4, %v114_v60, %v109_v61 }
  0xb4   :  { %v137_v1 = vsel %vm136_vm5, %v135_v62, %v116_v0 }
  0xb5   :  { %v139_v2 = vadd.f32 %v137_v1, %v41_v63 }
  0xb7   :  { %141 = vst.msk [vmem:[#allocation2] sm:$0x3] %vm39_vm0, %v139_v2 }
  0xbe   :  { %v145_v3 = vld [vmem:[#allocation2] sm:$0x3] }
  0xbf   :  { %v146_v4 = vmul.f32 0.00390625, %v145_v3 }
  0xc1   :  { %363 = vmatmul.mubr.msk.f32.vlgmr.msra.gmra.mrb[0].mxu0 %vm158_vm6, %v146_v4 }
 0x194   :  { %v228_v7 = vpop.f32.mrb[0].mxu0 }
 0x195   :  { %v229_v8 = vadd.f32 %v341_v6, %v228_v7  ;;  %v364_v9 = vpop.f32.mrb[1].mxu0 }
 0x197   :  { %v232_v10 = vmax.f32 %v229_v8, 0.0 }
 0x199   :  { %368 = vmatmul.mubr.msk.f32.vlgmr.msra.gmra.mrb[0].mxu1 %vm241_vm8, %v232_v10 }
 0x26c   :  { %v315_v12 = vpop.f32.mrb[0].mxu1 }
 0x26d   :  { %v316_v13 = vadd.f32 %v343_v11, %v315_v12  ;;  %v369_v14 = vpop.f32.mrb[1].mxu1 }
 0x26f   :  { %v346_v15 = vmul.f32 -1.442695, %v316_v13 }
 0x271   :  { %383 = vpow2.f32 %v346_v15 }
 0x27b   :  { %v384_v16 = vpop.eup %383 }
 0x27c   :  { %v322_v17 = vadd.f32 1.0, %v384_v16 }
 0x27e   :  { %385 = vrcp.f32 %v322_v17 }
 0x288   :  { %v386_v18 = vpop.eup %385 }
 0x289   :  { %325 = vst.msk [vmem:[#allocation6] sm:$0x3] %vm39_vm0, %v386_v18 }
 0x28a   :  { %420 = shalt.err (!%p417_p12)
}
 0x28b   :  { %s421_s21 = scalar_lea.hbm %s525_s5, 32 }
 0x28c   :  { %p422_p13 = scmp.ne.s32.totalorder %s525_s5, %s421_s21  ;;  %p425_p0 = scmp.lt.u32.totalorder %s421_s21, %s525_s5 }
 0x28e   :  { %p427_p1 = pnand %p425_p0, %p422_p13 }
 0x290   :  { %430 = shalt.err (!%p427_p1)
}
 0x291   :  { %335 = dma.vmem_to_hbm [thread:$0]  %s333_s2, 32, %s525_s5, [#allocation5]  }
 0x292   :  { %433 = dma.done.wait [#allocation5], 32  }
 0x293   :  { %434 = vsyncadd [#allocation5], 4294967264 }
 0x294   :  { %339 = vsyncpa [#allocation4], 1 }
 0x295   :  { %340 = vsyncpa [#allocation5], 1 }

</bundles_post_ra>
